<compile_context>
chip_gen: v7x
topology: tpu7x:2x2x1
jax: 0.10.0
libtpu: 0.0.40
codegen_flags: <defaults>
</compile_context>

<pallas_src>
import math

import jax
import jax.numpy as jnp
from jax.experimental import pallas as pl
from jax.experimental.pallas import tpu as pltpu

_LANES = 128


def _round_up(x, m):
    return ((x + m - 1) // m) * m


def _soft_iou_kernel(pred_ref, targ_ref, out_ref, prod_acc, sum_acc):
    # pred_ref / targ_ref : (B, TR, 128) tile in VMEM (native dtype)
    # out_ref             : (1, 1) f32
    # prod_acc / sum_acc  : (B, TR, 128) f32 VMEM scratch (persist across grid)
    k = pl.program_id(0)

    @pl.when(k == 0)
    def _init():
        prod_acc[...] = jnp.zeros_like(prod_acc)
        sum_acc[...] = jnp.zeros_like(sum_acc)

    p = pred_ref[...].astype(jnp.float32)
    t = targ_ref[...].astype(jnp.float32)

    # Steady state: element-wise VPU accumulation only (no XLU reduces).
    prod_acc[...] += p * t
    sum_acc[...] += p + t

    @pl.when(k == pl.num_programs(0) - 1)
    def _finalize():
        smooth = 1.0

        def reduce_bd(acc_ref):  # (B, TR, 128) -> (B, 1)
            s = jnp.sum(acc_ref[...], axis=2)          # lanes
            return jnp.sum(s, axis=1, keepdims=True)   # sublanes

        inter = reduce_bd(prod_acc)                    # sum(p * t)
        both = reduce_bd(sum_acc)                      # sum(p) + sum(t)
        ratio = (inter + smooth) / (both - inter + smooth)  # (B, 1)
        loss = 1.0 - jnp.mean(ratio)
        out_ref[...] = loss.reshape(1, 1)


def soft_iou_loss(pred, target, *, block_rows=512, interpret=False):
    """SoftLoULoss forward: pred/target are (B, C, H, W); returns scalar f32 loss."""
    assert pred.shape == target.shape, (pred.shape, target.shape)
    B = pred.shape[0]
    N = math.prod(pred.shape[1:])

    # Row-major flatten only; keep native dtype (cast happens in-kernel).
    p2 = pred.reshape(B, N)
    t2 = target.reshape(B, N)

    r = pl.cdiv(N, _LANES)
    tr = min(_round_up(block_rows, 8), _round_up(r, 8))
    r_pad = _round_up(r, tr)
    n_pad = r_pad * _LANES
    if n_pad != N:
        # Zero padding is exact for both running sums.
        p2 = jnp.pad(p2, ((0, 0), (0, n_pad - N)))
        t2 = jnp.pad(t2, ((0, 0), (0, n_pad - N)))

    p3 = p2.reshape(B, r_pad, _LANES)
    t3 = t2.reshape(B, r_pad, _LANES)
    num_tiles = r_pad // tr

    out = pl.pallas_call(
        _soft_iou_kernel,
        out_shape=jax.ShapeDtypeStruct((1, 1), jnp.float32),
        grid_spec=pltpu.PrefetchScalarGridSpec(
            num_scalar_prefetch=0,
            grid=(num_tiles,),
            in_specs=[
                pl.BlockSpec((B, tr, _LANES), lambda k: (0, k, 0)),
                pl.BlockSpec((B, tr, _LANES), lambda k: (0, k, 0)),
            ],
            out_specs=pl.BlockSpec((1, 1), lambda k: (0, 0)),
            scratch_shapes=[
                pltpu.VMEM((B, tr, _LANES), jnp.float32),
                pltpu.VMEM((B, tr, _LANES), jnp.float32),
            ],
        ),
        compiler_params=pltpu.CompilerParams(
            dimension_semantics=("arbitrary",),
        ),
        interpret=interpret,
    )(p3, t3)
    return out[0, 0]


def _reference(pred, target):
    """Pure-JAX mirror of the PyTorch SoftLoULoss.forward."""
    pred = pred.astype(jnp.float32)
    target = target.astype(jnp.float32)
    smooth = 1.0
    inter = jnp.sum(pred * target, axis=(1, 2, 3))
    ps = jnp.sum(pred, axis=(1, 2, 3))
    ts = jnp.sum(target, axis=(1, 2, 3))
    ratio = (inter + smooth) / (ps + ts - inter + smooth)
    return 1.0 - jnp.mean(ratio)


if __name__ == "__main__":
    key = jax.random.PRNGKey(0)
    keys = jax.random.split(key, 4)

    # Case 1: f32 inputs at the canonical small shape.
    B, C, H, W = 2, 4, 16, 16
    pred = jax.nn.sigmoid(jax.random.normal(keys[0], (B, C, H, W), jnp.float32))
    target = (jax.random.uniform(keys[1], (B, C, H, W)) > 0.5).astype(jnp.float32)

    loss = soft_iou_loss(pred, target)
    jax.block_until_ready(loss)
    ref = _reference(pred, target)
    assert jnp.allclose(loss, ref, atol=1e-5, rtol=1e-5), (loss, ref)

    # Case 2: bf16 inputs with N not a multiple of 128 (exercises the in-kernel
    # cast and the zero-padded tail tile).
    B2, C2, H2, W2 = 2, 3, 10, 7
    pred2 = jax.nn.sigmoid(
        jax.random.normal(keys[2], (B2, C2, H2, W2), jnp.float32)
    ).astype(jnp.bfloat16)
    target2 = (jax.random.uniform(keys[3], (B2, C2, H2, W2)) > 0.5).astype(jnp.bfloat16)

    loss2 = soft_iou_loss(pred2, target2)
    jax.block_until_ready(loss2)
    ref2 = _reference(pred2, target2)
    assert jnp.allclose(loss2, ref2, atol=1e-5, rtol=1e-5), (loss2, ref2)

    print("KERNEL_OK")
</pallas_src>

<mosaic_0001>
module attributes {stable_mosaic.version = 11 : i64} {
  func.func @_soft_iou_kernel(%arg0: i32, %arg1: memref<2x8x128xf32, #tpu.memory_space<vmem>>, %arg2: memref<2x8x128xf32, #tpu.memory_space<vmem>>, %arg3: memref<1x1xf32, #tpu.memory_space<vmem>>, %arg4: memref<2x8x128xf32, #tpu.memory_space<vmem>>, %arg5: memref<2x8x128xf32, #tpu.memory_space<vmem>>) attributes {dimension_semantics = [#tpu.dimension_semantics<arbitrary>], iteration_bounds = array<i64: 1>, scalar_prefetch = 0 : i64, scratch_operands = 2 : i64, tpu.core_type = #tpu.core_type<tc>, window_params = [{transform_indices = @transform_0, window_bounds = array<i64: 2, 8, 128>}, {transform_indices = @transform_1, window_bounds = array<i64: 2, 8, 128>}, {pipeline_mode = #tpu.pipeline_mode<synchronous>, transform_indices = @transform_2, window_bounds = array<i64: 1, 1>}]} {
    %c0_i32 = arith.constant 0 : i32
    %0 = arith.cmpi eq, %arg0, %c0_i32 : i32
    %1 = arith.extui %0 : i1 to i32
    %c0_i32_0 = arith.constant 0 : i32
    %2 = arith.cmpi ne, %1, %c0_i32_0 : i32
    scf.if %2 {
      %cst = arith.constant 0.000000e+00 : f32
      %16 = vector.broadcast %cst : f32 to vector<2x8x128xf32>
      %c0_20 = arith.constant 0 : index
      %c0_21 = arith.constant 0 : index
      %c0_22 = arith.constant 0 : index
      %17 = vector.load %arg4[%c0_20, %c0_21, %c0_22] : memref<2x8x128xf32, #tpu.memory_space<vmem>>, vector<2x8x128xf32>
      tpu.vector_store %arg4[%c0_20, %c0_21, %c0_22], %16 {strides = array<i32>} : memref<2x8x128xf32, #tpu.memory_space<vmem>>, vector<2x8x128xf32>,
      %cst_23 = arith.constant 0.000000e+00 : f32
      %18 = vector.broadcast %cst_23 : f32 to vector<2x8x128xf32>
      %c0_24 = arith.constant 0 : index
      %c0_25 = arith.constant 0 : index
      %c0_26 = arith.constant 0 : index
      %19 = vector.load %arg5[%c0_24, %c0_25, %c0_26] : memref<2x8x128xf32, #tpu.memory_space<vmem>>, vector<2x8x128xf32>
      tpu.vector_store %arg5[%c0_24, %c0_25, %c0_26], %18 {strides = array<i32>} : memref<2x8x128xf32, #tpu.memory_space<vmem>>, vector<2x8x128xf32>,
    } else {
    }
    %c0 = arith.constant 0 : index
    %c0_1 = arith.constant 0 : index
    %c0_2 = arith.constant 0 : index
    %3 = vector.load %arg1[%c0, %c0_1, %c0_2] : memref<2x8x128xf32, #tpu.memory_space<vmem>>, vector<2x8x128xf32>
    %c0_3 = arith.constant 0 : index
    %c0_4 = arith.constant 0 : index
    %c0_5 = arith.constant 0 : index
    %4 = vector.load %arg2[%c0_3, %c0_4, %c0_5] : memref<2x8x128xf32, #tpu.memory_space<vmem>>, vector<2x8x128xf32>
    %c0_6 = arith.constant 0 : index
    %c0_7 = arith.constant 0 : index
    %c0_8 = arith.constant 0 : index
    %5 = vector.load %arg4[%c0_6, %c0_7, %c0_8] : memref<2x8x128xf32, #tpu.memory_space<vmem>>, vector<2x8x128xf32>
    %6 = arith.mulf %3, %4 : vector<2x8x128xf32>
    %7 = arith.addf %5, %6 : vector<2x8x128xf32>
    %c0_9 = arith.constant 0 : index
    %c0_10 = arith.constant 0 : index
    %c0_11 = arith.constant 0 : index
    %8 = vector.load %arg4[%c0_9, %c0_10, %c0_11] : memref<2x8x128xf32, #tpu.memory_space<vmem>>, vector<2x8x128xf32>
    tpu.vector_store %arg4[%c0_9, %c0_10, %c0_11], %7 {strides = array<i32>} : memref<2x8x128xf32, #tpu.memory_space<vmem>>, vector<2x8x128xf32>,
    %c0_12 = arith.constant 0 : index
    %c0_13 = arith.constant 0 : index
    %c0_14 = arith.constant 0 : index
    %9 = vector.load %arg5[%c0_12, %c0_13, %c0_14] : memref<2x8x128xf32, #tpu.memory_space<vmem>>, vector<2x8x128xf32>
    %10 = arith.addf %3, %4 : vector<2x8x128xf32>
    %11 = arith.addf %9, %10 : vector<2x8x128xf32>
    %c0_15 = arith.constant 0 : index
    %c0_16 = arith.constant 0 : index
    %c0_17 = arith.constant 0 : index
    %12 = vector.load %arg5[%c0_15, %c0_16, %c0_17] : memref<2x8x128xf32, #tpu.memory_space<vmem>>, vector<2x8x128xf32>
    tpu.vector_store %arg5[%c0_15, %c0_16, %c0_17], %11 {strides = array<i32>} : memref<2x8x128xf32, #tpu.memory_space<vmem>>, vector<2x8x128xf32>,
    %c0_i32_18 = arith.constant 0 : i32
    %13 = arith.cmpi eq, %arg0, %c0_i32_18 : i32
    %14 = arith.extui %13 : i1 to i32
    %c0_i32_19 = arith.constant 0 : i32
    %15 = arith.cmpi ne, %14, %c0_i32_19 : i32
    scf.if %15 {
      %c0_20 = arith.constant 0 : index
      %c0_21 = arith.constant 0 : index
      %c0_22 = arith.constant 0 : index
      %16 = vector.load %arg4[%c0_20, %c0_21, %c0_22] : memref<2x8x128xf32, #tpu.memory_space<vmem>>, vector<2x8x128xf32>
      %cst = arith.constant dense<0.000000e+00> : vector<2x8xf32>
      %17 = vector.multi_reduction <add>, %16, %cst [2] : vector<2x8x128xf32> to vector<2x8xf32>
      %cst_23 = arith.constant dense<0.000000e+00> : vector<2xf32>
      %18 = vector.multi_reduction <add>, %17, %cst_23 [1] : vector<2x8xf32> to vector<2xf32>
      %19 = vector.shape_cast %18 : vector<2xf32> to vector<2x1xf32>
      %c0_24 = arith.constant 0 : index
      %c0_25 = arith.constant 0 : index
      %c0_26 = arith.constant 0 : index
      %20 = vector.load %arg5[%c0_24, %c0_25, %c0_26] : memref<2x8x128xf32, #tpu.memory_space<vmem>>, vector<2x8x128xf32>
      %cst_27 = arith.constant dense<0.000000e+00> : vector<2x8xf32>
      %21 = vector.multi_reduction <add>, %20, %cst_27 [2] : vector<2x8x128xf32> to vector<2x8xf32>
      %cst_28 = arith.constant dense<0.000000e+00> : vector<2xf32>
      %22 = vector.multi_reduction <add>, %21, %cst_28 [1] : vector<2x8xf32> to vector<2xf32>
      %23 = vector.shape_cast %22 : vector<2xf32> to vector<2x1xf32>
      %cst_29 = arith.constant 1.000000e+00 : f32
      %24 = vector.broadcast %cst_29 : f32 to vector<2x1xf32>
      %25 = arith.addf %19, %24 : vector<2x1xf32>
      %26 = arith.subf %23, %19 : vector<2x1xf32>
      %cst_30 = arith.constant 1.000000e+00 : f32
      %27 = vector.broadcast %cst_30 : f32 to vector<2x1xf32>
      %28 = arith.addf %26, %27 : vector<2x1xf32>
      %29 = arith.divf %25, %28 : vector<2x1xf32>
      %30 = vector.shape_cast %29 : vector<2x1xf32> to vector<1x2x1xf32>
      %cst_31 = arith.constant dense<0.000000e+00> : vector<1xf32>
      %31 = vector.multi_reduction <add>, %30, %cst_31 [1, 2] : vector<1x2x1xf32> to vector<1xf32>
      %32 = vector.shape_cast %31 : vector<1xf32> to vector<1x1x1xf32>
      %33 = vector.extract %32[0, 0, 0] : f32 from vector<1x1x1xf32>
      %cst_32 = arith.constant 2.000000e+00 : f32
      %34 = arith.divf %33, %cst_32 : f32
      %cst_33 = arith.constant 1.000000e+00 : f32
      %35 = arith.subf %cst_33, %34 : f32
      %36 = vector.broadcast %35 : f32 to vector<1x1xf32>
      %c0_34 = arith.constant 0 : index
      %c0_35 = arith.constant 0 : index
      %37 = vector.load %arg3[%c0_34, %c0_35] : memref<1x1xf32, #tpu.memory_space<vmem>>, vector<1x1xf32>
      tpu.vector_store %arg3[%c0_34, %c0_35], %36 {strides = array<i32>} : memref<1x1xf32, #tpu.memory_space<vmem>>, vector<1x1xf32>,
    } else {
    }
    return
  }
  func.func @transform_0(%arg0: i32) -> (i32, i32, i32) {
    %c0_i32 = arith.constant 0 : i32
    %c0_i32_0 = arith.constant 0 : i32
    %c0_i32_1 = arith.constant 0 : i32
    return %c0_i32, %arg0, %c0_i32_0 : i32, i32, i32
  }
  func.func @transform_1(%arg0: i32) -> (i32, i32, i32) {
    %c0_i32 = arith.constant 0 : i32
    %c0_i32_0 = arith.constant 0 : i32
    %c0_i32_1 = arith.constant 0 : i32
    return %c0_i32, %arg0, %c0_i32_0 : i32, i32, i32
  }
  func.func @transform_2(%arg0: i32) -> (i32, i32) {
    %c0_i32 = arith.constant 0 : i32
    %c0_i32_0 = arith.constant 0 : i32
    %c0_i32_1 = arith.constant 0 : i32
    return %c0_i32, %c0_i32_0 : i32, i32
  }
}

</mosaic_0001>

<bundles_post_ra>
// kernel: tpu_custom_call.1
= control target key start
LH: loop header
LB: loop body
LE: loop exit
PB: predicated region body
PF: predicated region fallthrough
CT: control target
= control target key end

     0   :  { %7 = vsyncpa [#allocation5], 0  ;;  %s293_s0 = inlined_call_operand.hbm [shape: f32[2,8,128], index: 0, kind: input, shape index: {}]   ;;  %s294_s1 = inlined_call_operand.hbm [shape: f32[2,8,128], index: 1, kind: input, shape index: {}]   ;;  %s295_s2 = inlined_call_operand.hbm [shape: f32[1,1], index: 2, kind: output, shape index: {}]  }
   0x1   :  { %8 = vsyncpa [#allocation8], 0 }
   0x2   :  { %9 = vsyncpa [#allocation6], 0  ;;  %s237_s9 = smov [#allocation4]   ;;  %s165_s13 = scalar_lea.hbm %s293_s0, 256 }
   0x3   :  { %s15_s10 = sshll.u32 %s237_s9, 4  ;;  %p166_p0 = scmp.ne.s32.totalorder %s293_s0, %s165_s13  ;;  %s16_s10 = int_to_ptr.vmem [resolvable:$true] %s15_s10 }
   0x4   :  { %p169_p1 = scmp.lt.u32.totalorder %s165_s13, %s293_s0 }
   0x6   :  { %p171_p2 = pnand %p169_p1, %p166_p0 }
   0x8   :  { %174 = shalt.err (!%p171_p2)
}
   0x9   :  { %s175_s18 = scalar_lea.vmem %s16_s10, 256  ;;  %p180_p4 = scmp.lt.s32.totalorder %s16_s10, %s16_s10 }
   0xa   :  { %p176_p3 = scmp.ne.s32.totalorder %s16_s10, %s175_s18  ;;  %p181_p5 = scmp.lt.s32.totalorder %s175_s18, %s175_s18 }
   0xc   :  { %p182_p6 = por %p181_p5, %p180_p4 }
   0xe   :  { %p183_p7 = pnand %p182_p6, %p176_p3 }
  0x10   :  { %186 = shalt.err (!%p183_p7)
}
  0x11   :  { %s238_s19 = smov 128   ;;  %s239_s20 = smov 8  }
  0x12   :  { %21 = dma.hbm_to_vmem [thread:$0]  %s293_s0, 256, %s16_s10, [#allocation5], %s238_s19, %s238_s19, %s239_s20  }
  0x13   :  { %s240_s23 = smov [#allocation7]   ;;  %s187_s27 = scalar_lea.hbm %s294_s1, 256 }
  0x14   :  { %s27_s24 = sshll.u32 %s240_s23, 4  ;;  %p188_p8 = scmp.ne.s32.totalorder %s294_s1, %s187_s27  ;;  %s28_s24 = int_to_ptr.vmem [resolvable:$true] %s27_s24 }
  0x15   :  { %p191_p9 = scmp.lt.u32.totalorder %s187_s27, %s294_s1 }
  0x17   :  { %p193_p10 = pnand %p191_p9, %p188_p8 }
  0x19   :  { %196 = shalt.err (!%p193_p10)
}
  0x1a   :  { %s197_s4 = scalar_lea.vmem %s28_s24, 256  ;;  %p202_p12 = scmp.lt.s32.totalorder %s28_s24, %s28_s24 }
  0x1b   :  { %p198_p11 = scmp.ne.s32.totalorder %s28_s24, %s197_s4  ;;  %p203_p13 = scmp.lt.s32.totalorder %s197_s4, %s197_s4 }
  0x1d   :  { %p204_p0 = por %p203_p13, %p202_p12 }
  0x1f   :  { %p205_p1 = pnand %p204_p0, %p198_p11 }
  0x21   :  { %208 = shalt.err (!%p205_p1)
}
  0x22   :  { %33 = dma.hbm_to_vmem [thread:$0]  %s294_s1, 256, %s28_s24, [#allocation8], %s238_s19, %s238_s19, %s239_s20  }
  0x23   :  { %231 = dma.done.wait [#allocation5], 256  }
  0x24   :  { %232 = vsyncadd [#allocation5], 4294967040 }
  0x25   :  { %233 = dma.done.wait [#allocation8], 256  }
  0x26   :  { %234 = vsyncadd [#allocation8], 4294967040  ;;  %v48_v0 = vld [vmem:[#allocation4] sm:$0xff]  ;;  %v50_v1 = vld [vmem:[#allocation7] sm:$0xff]  ;;  %v79_v8 = vlaneseq  ;;  %vm89_vm0 = vcmask 1041409   ;;  %vm92_vm1 = vcmask 58368  }
  0x27   :  { %v49_v2 = vld [vmem:[#allocation4 + $0x8] sm:$0xff]  ;;  %v62_v3 = vadd.f32 %v50_v1, %v48_v0  ;;  %v54_v4 = vmul.f32 %v50_v1, %v48_v0  ;;  %v51_v5 = vld [vmem:[#allocation7 + $0x8] sm:$0xff]  ;;  %vm122_vm2 = vcmask 1024   ;;  %s241_s7 = smov [#allocation9]   ;;  %vm138_vm3 = vcmask 0  }
  0x28   :  { %v63_v6 = vadd.f32 %v51_v5, %v49_v2  ;;  %v55_v7 = vmul.f32 %v51_v5, %v49_v2  ;;  %v80_v9 = vand.u32 127, %v79_v8  ;;  %v82_v10 = vshrl.u32 %v79_v8, 7  ;;  %s146_s8 = sshll.u32 %s241_s7, 4  ;;  %s147_s8 = int_to_ptr.vmem [resolvable:$true] %s146_s8 }
  0x29   :  { %98 = vadd.xlane.f32.xlu1 %v62_v3  ;;  %73 = vadd.xlane.f32.xlu0 %v54_v4  ;;  %s209_s10 = scalar_lea.vmem %s147_s8, 16  ;;  %s213_s11 = scalar_lea.vmem %s147_s8, 32 }
  0x2a   :  { %v83_v13 = vsub.s32 %v80_v9, %v82_v10  ;;  %p210_p2 = scmp.ne.s32.totalorder %s147_s8, %s209_s10  ;;  %p214_p3 = scmp.lt.s32.totalorder %s147_s8, %s147_s8 }
  0x2b   :  { %p215_p4 = scmp.lt.s32.totalorder %s213_s11, %s209_s10 }
  0x2d   :  { %100 = vadd.xlane.f32.xlu1 %v63_v6  ;;  %75 = vadd.xlane.f32.xlu0 %v55_v7  ;;  %p216_p5 = por %p215_p4, %p214_p3 }
  0x2f   :  { %p217_p6 = pnand %p216_p5, %p210_p2 }
  0xb6   :  { %v99_v11 = vpop.xlane.xlu1 %98  ;;  %v74_v12 = vpop.xlane.xlu0 %73 }
  0xb7   :  { %v107_v16 = vrot.slane %v99_v11, %v83_v13  ;;  %v84_v17 = vrot.slane %v74_v12, %v83_v13 }
  0xba   :  { %v101_v14 = vpop.xlane.xlu1 %100  ;;  %v76_v15 = vpop.xlane.xlu0 %75 }
  0xbb   :  { %v111_v18 = vrot.slane %v101_v14, %v83_v13  ;;  %v88_v19 = vrot.slane %v76_v15, %v83_v13 }
  0xbd   :  { %v112_v20 = vsel %vm89_vm0, %v111_v18, %v107_v16  ;;  %v90_v21 = vsel %vm89_vm0, %v88_v19, %v84_v17 }
  0xbe   :  { %v114_v22 = vsel %vm92_vm1, %v112_v20, 0.0  ;;  %v93_v23 = vsel %vm92_vm1, %v90_v21, 0.0 }
  0xbf   :  { %115 = vadd.xlane.f32.xlu1 %v114_v22  ;;  %94 = vadd.xlane.f32.xlu0 %v93_v23 }
 0x14c   :  { %v116_v24 = vpop.xlane.xlu1 %115  ;;  %v95_v25 = vpop.xlane.xlu0 %94 }
 0x14d   :  { %v118_v26 = vsub.f32 %v116_v24, %v95_v25  ;;  %v117_v28 = vadd.f32 1.0, %v95_v25 }
 0x14f   :  { %v119_v27 = vadd.f32 1.0, %v118_v26 }
 0x151   :  { %163 = vrcp.f32 %v119_v27 }
 0x15b   :  { %v164_v29 = vpop.eup %163 }
 0x15c   :  { %v121_v30 = vmul.f32 %v164_v29, %v117_v28 }
 0x15e   :  { %v123_v31 = vsel %vm122_vm2, %v121_v30, 0.0 }
 0x15f   :  { %124 = vadd.xlane.f32.xlu0 %v123_v31 }
 0x1ec   :  { %v125_v32 = vpop.xlane.xlu0 %124 }
 0x1ed   :  { %v126_v33 = vrot.slane %v125_v32, 4 }
 0x1ef   :  { %v127_v34 = vadd.f32 %v126_v33, %v125_v32 }
 0x1f1   :  { %v128_v35 = vrot.slane %v127_v34, 2 }
 0x1f3   :  { %v129_v36 = vadd.f32 %v128_v35, %v127_v34 }
 0x1f5   :  { %v130_v37 = vrot.slane %v129_v36, 1 }
 0x1f7   :  { %v131_v38 = vadd.f32 %v130_v37, %v129_v36 }
 0x1f9   :  { %156 = vpush %v131_v38 }
 0x22a   :  { %s157_s1 = spop %156 }
 0x22b   :  { %s135_s6 = smul.f32 0.5, %s157_s1 }
 0x22d   :  { %s136_s9 = ssub.f32 1.0, %s135_s6 }
 0x22f   :  { %v137_v39 = vstv %s136_s9 }
 0x230   :  { %139 = vst.msk [vmem:[#allocation9] sm:$0x1] %vm138_vm3, %v137_v39 }
 0x231   :  { %220 = shalt.err (!%p217_p6)
}
 0x232   :  { %s221_s14 = scalar_lea.hbm %s295_s2, 16 }
 0x233   :  { %p222_p7 = scmp.ne.s32.totalorder %s295_s2, %s221_s14  ;;  %p225_p8 = scmp.lt.u32.totalorder %s221_s14, %s295_s2 }
 0x235   :  { %p227_p9 = pnand %p225_p8, %p222_p7 }
 0x237   :  { %230 = shalt.err (!%p227_p9)
}
 0x238   :  { %149 = dma.vmem_to_hbm [thread:$0]  %s147_s8, 16, %s295_s2, [#allocation6]  }
 0x239   :  { %235 = dma.done.wait [#allocation6], 16  }
 0x23a   :  { %236 = vsyncadd [#allocation6], 4294967280 }
 0x23b   :  { %153 = vsyncpa [#allocation5], 1 }
 0x23c   :  { %154 = vsyncpa [#allocation8], 1 }
 0x23d   :  { %155 = vsyncpa [#allocation6], 1 }

</bundles_post_ra>
